<compile_context>
chip_gen: v6e
topology: v6e:2x2x1
jax: 0.10.0
libtpu: 0.0.40
codegen_flags: <defaults>
</compile_context>

<pallas_src>
import jax
import jax.numpy as jnp
from jax.experimental import pallas as pl
from jax.experimental.pallas import tpu as pltpu


def _embed_kernel(patch_ref, w_ref, posb_ref, out_ref):
    # patch_ref: [1, Bt*L, K] bf16   w_ref: [K, E] bf16
    # posb_ref:  [Bt*L, E]    f32    out_ref: [1, Bt*L, E] f32
    y = jnp.dot(patch_ref[0], w_ref[...],
                preferred_element_type=jnp.float32)      # MXU, f32 accumulate
    out_ref[0] = (y + posb_ref[...]).astype(out_ref.dtype)


def _patchify_nchw(x, patch_size):
    """nn.Unfold(kernel=p, stride=p) followed by permute(0, 2, 1).

    x: [B, C, H, W] -> [B, L, C*p*p], per-patch flatten order (c, kh, kw),
    patches ordered row-major over (H//p, W//p), matching PyTorch.
    """
    B, C, H, W = x.shape
    p = patch_size
    x = x.reshape(B, C, H // p, p, W // p, p)
    x = x.transpose(0, 2, 4, 1, 3, 5)                    # [B, H//p, W//p, C, p, p]
    return x.reshape(B, (H // p) * (W // p), C * p * p)


def _choose_block_batch(B, L, target_rows=512):
    """Pick images-per-grid-step so Bt*L ~ target_rows, B % Bt == 0, and
    (when possible) the grid keeps >= 2 steps so v7x's second TC has work."""
    bt = max(1, target_rows // max(L, 1))
    if B >= 2:
        bt = min(bt, max(1, B // 2))       # keep at least 2 grid steps
    bt = min(bt, B)
    while B % bt != 0:
        bt -= 1
    return bt


def vision_transformer_input(x, weight, bias, position_embed, patch_size,
                             block_batch=None, out_dtype=jnp.float32):
    """Forward pass equivalent of VisionTransformerInput.

    x:              [B, C, H, W] float32 (NCHW, like PyTorch)
    weight:         [E, K] (PyTorch nn.Linear layout, K = C*p*p)
    bias:           [E]
    position_embed: [L, E], L = (H//p) * (W//p)
    returns:        [B, L, E] in out_dtype (f32 by default; pass bf16 if the
                    downstream transformer blocks consume bf16)
    """
    B, C, H, W = x.shape
    p = patch_size
    L = (H // p) * (W // p)
    K = C * p * p
    E = weight.shape[0]

    bt = _choose_block_batch(B, L) if block_batch is None else block_batch
    nb = B // bt
    rows = bt * L

    # ---- layout glue (fused into the input DMA via allow_input_fusion) ----
    patches = _patchify_nchw(x, p)                       # [B, L, K]
    patches = patches.reshape(nb, rows, K)               # row-major merge: free
    patches = patches.astype(jnp.bfloat16)               # MXU-native dtype
    w_t = weight.T.astype(jnp.bfloat16)                  # [K, E]

    # Fold bias into the position embedding (exact, done in f32) and pre-tile
    # across the images in one block: kernel then does a single f32 add.
    posb = jnp.tile(position_embed.astype(jnp.float32)
                    + bias.astype(jnp.float32)[None, :], (bt, 1))   # [rows, E]

    # ---- VMEM budget for the chosen block (double-buffered streams) -------
    out_itemsize = jnp.dtype(out_dtype).itemsize
    block_bytes = (2 * rows * K * 2            # patches block, 2 buffers, bf16
                   + 2 * rows * E * out_itemsize   # output block, 2 buffers
                   + 2 * K * E * 2             # resident weight (bf16)
                   + 2 * rows * E * 4)         # resident pos+bias (f32)
    vmem_limit = int(min(max(2 * block_bytes, 32 * 1024 * 1024),
                         64 * 1024 * 1024))

    cost = pl.CostEstimate(
        flops=2 * B * L * K * E + B * L * E,
        transcendentals=0,
        bytes_accessed=(B * L * K * 2 + K * E * 2 + rows * E * 4
                        + B * L * E * out_itemsize),
    )

    out = pl.pallas_call(
        _embed_kernel,
        out_shape=jax.ShapeDtypeStruct((nb, rows, E), out_dtype),
        grid_spec=pltpu.PrefetchScalarGridSpec(
            num_scalar_prefetch=0,
            grid=(nb,),
            in_specs=[
                pl.BlockSpec((1, rows, K), lambda b: (b, 0, 0)),   # patches
                pl.BlockSpec((K, E), lambda b: (0, 0)),            # weight^T
                pl.BlockSpec((rows, E), lambda b: (0, 0)),         # pos + bias
            ],
            out_specs=pl.BlockSpec((1, rows, E), lambda b: (b, 0, 0)),
        ),
        compiler_params=pltpu.CompilerParams(
            dimension_semantics=("parallel",),
            vmem_limit_bytes=vmem_limit,
            # Fuse the patchify reshape/transpose + bf16 cast into the input
            # pipeline so the [B, L, K] patch tensor isn't materialised in HBM.
            allow_input_fusion=[True, False, False],
        ),
        cost_estimate=cost,
    )(patches, w_t, posb)

    return out.reshape(B, L, E)


if __name__ == "__main__":
    # Small shapes consistent with the module.
    image_size = 16
    patch_size = 4
    in_channels = 4
    embed_size = 32
    batch = 2

    K = patch_size * patch_size * in_channels            # 64
    L = (image_size // patch_size) ** 2                  # 16

    key = jax.random.PRNGKey(0)
    kx, kw, kb, kp = jax.random.split(key, 4)

    x = jax.random.normal(kx, (batch, in_channels, image_size, image_size),
                          dtype=jnp.float32)
    # Deterministic synthetic parameters (shapes match nn.Linear / nn.Parameter).
    weight = jax.random.normal(kw, (embed_size, K), dtype=jnp.float32) * 0.02
    bias = jax.random.normal(kb, (embed_size,), dtype=jnp.float32) * 0.02
    position_embed = jax.random.normal(kp, (L, embed_size), dtype=jnp.float32)

    out = vision_transformer_input(x, weight, bias, position_embed, patch_size)
    out = jax.block_until_ready(out)
    assert out.shape == (batch, L, embed_size)

    # Reference with the same bf16-input / f32-accumulate math (tight check).
    patches_ref = _patchify_nchw(x, patch_size)
    ref_bf16 = (jnp.dot(patches_ref.astype(jnp.bfloat16),
                        weight.T.astype(jnp.bfloat16),
                        preferred_element_type=jnp.float32)
                + bias[None, None, :] + position_embed[None])
    assert jnp.allclose(out, ref_bf16, atol=2e-3, rtol=2e-3)

    # Full f32 reference of the module's math (loose check: bf16 rounding only).
    ref_f32 = patches_ref @ weight.T + bias + position_embed[None]
    assert jnp.allclose(out, ref_f32, atol=5e-2, rtol=5e-2)

    print("KERNEL_OK")
</pallas_src>

<mosaic_0001>
module attributes {stable_mosaic.version = 11 : i64} {
  func.func @_embed_kernel(%arg0: i32, %arg1: memref<1x16x64xbf16, #tpu.memory_space<vmem>>, %arg2: memref<64x32xbf16, #tpu.memory_space<vmem>>, %arg3: memref<16x32xf32, #tpu.memory_space<vmem>>, %arg4: memref<1x16x32xf32, #tpu.memory_space<vmem>>) attributes {dimension_semantics = [#tpu.dimension_semantics<parallel>], iteration_bounds = array<i64: 2>, scalar_prefetch = 0 : i64, scratch_operands = 0 : i64, tpu.core_type = #tpu.core_type<tc>, window_params = [{transform_indices = @transform_0, window_bounds = array<i64: 1, 16, 64>}, {pipeline_mode = #tpu.pipeline_mode<synchronous>, transform_indices = @transform_1, window_bounds = array<i64: 64, 32>}, {pipeline_mode = #tpu.pipeline_mode<synchronous>, transform_indices = @transform_2, window_bounds = array<i64: 16, 32>}, {transform_indices = @transform_3, window_bounds = array<i64: 1, 16, 32>}]} {
    %c0 = arith.constant 0 : index
    %c0_0 = arith.constant 0 : index
    %c0_1 = arith.constant 0 : index
    %0 = vector.load %arg1[%c0, %c0_0, %c0_1] : memref<1x16x64xbf16, #tpu.memory_space<vmem>>, vector<1x16x64xbf16>
    %1 = vector.shape_cast %0 : vector<1x16x64xbf16> to vector<16x64xbf16>
    %c0_2 = arith.constant 0 : index
    %c0_3 = arith.constant 0 : index
    %2 = vector.load %arg2[%c0_2, %c0_3] : memref<64x32xbf16, #tpu.memory_space<vmem>>, vector<64x32xbf16>
    %cst = arith.constant dense<0.000000e+00> : vector<16x32xf32>
    %3 = tpu.matmul %1, %2, %cst {dimension_numbers = #tpu.dot_dimension_numbers<[1], [0], [0], [1], [0, 0, 1, 1], [], []>} : vector<16x64xbf16>, vector<64x32xbf16>, vector<16x32xf32> -> vector<16x32xf32>
    %c0_4 = arith.constant 0 : index
    %c0_5 = arith.constant 0 : index
    %4 = vector.load %arg3[%c0_4, %c0_5] : memref<16x32xf32, #tpu.memory_space<vmem>>, vector<16x32xf32>
    %5 = arith.addf %3, %4 : vector<16x32xf32>
    %c0_6 = arith.constant 0 : index
    %c0_7 = arith.constant 0 : index
    %c0_8 = arith.constant 0 : index
    %6 = vector.load %arg4[%c0_6, %c0_7, %c0_8] : memref<1x16x32xf32, #tpu.memory_space<vmem>>, vector<1x16x32xf32>
    %7 = vector.shape_cast %6 : vector<1x16x32xf32> to vector<16x32xf32>
    %8 = vector.shape_cast %5 : vector<16x32xf32> to vector<1x16x32xf32>
    tpu.vector_store %arg4[%c0_6, %c0_7, %c0_8], %8 {strides = array<i32>} : memref<1x16x32xf32, #tpu.memory_space<vmem>>, vector<1x16x32xf32>,
    return
  }
  func.func @transform_0(%arg0: i32) -> (i32, i32, i32) {
    %c0_i32 = arith.constant 0 : i32
    %c0_i32_0 = arith.constant 0 : i32
    %c0_i32_1 = arith.constant 0 : i32
    return %arg0, %c0_i32, %c0_i32_0 : i32, i32, i32
  }
  func.func @transform_1(%arg0: i32) -> (i32, i32) {
    %c0_i32 = arith.constant 0 : i32
    %c0_i32_0 = arith.constant 0 : i32
    %c0_i32_1 = arith.constant 0 : i32
    return %c0_i32, %c0_i32_0 : i32, i32
  }
  func.func @transform_2(%arg0: i32) -> (i32, i32) {
    %c0_i32 = arith.constant 0 : i32
    %c0_i32_0 = arith.constant 0 : i32
    %c0_i32_1 = arith.constant 0 : i32
    return %c0_i32, %c0_i32_0 : i32, i32
  }
  func.func @transform_3(%arg0: i32) -> (i32, i32, i32) {
    %c0_i32 = arith.constant 0 : i32
    %c0_i32_0 = arith.constant 0 : i32
    %c0_i32_1 = arith.constant 0 : i32
    return %arg0, %c0_i32, %c0_i32_0 : i32, i32, i32
  }
}

</mosaic_0001>

<bundles_post_ra>
// kernel: tpu_custom_call.1
= control target key start
LH: loop header
LB: loop body
LE: loop exit
PB: predicated region body
PF: predicated region fallthrough
CT: control target
= control target key end

     0   :  { %8 = vsyncpa [#allocation3], 0  ;;  %s627_s0 = inlined_call_operand.vmem [shape: bf16[2,16,64], index: 0, kind: input, shape index: {}]   ;;  %s628_s1 = inlined_call_operand.vmem [shape: bf16[64,32], index: 1, kind: input, shape index: {}]   ;;  %s629_s2 = inlined_call_operand.vmem [shape: f32[16,32], index: 2, kind: input, shape index: {}]   ;;  %s630_s3 = inlined_call_operand.hbm [shape: f32[2,16,32], index: 3, kind: output, shape index: {}]  }
   0x1   :  { %10 = vsyncpa [#allocation3 + $0x1], 0  ;;  %s507_s12 = smov 0   ;;  %s509_s13 = smov 0  }
   0x2   :  { %s511_s14 = smov 0   ;;  %s513_s15 = smov 0  }
   0x3 LB: > { %s528_s16 = sadd.s32 4294967295, %s480_s15   ;;  %s335_s17 = sadd.s32 4294967294, %s480_s15   ;;  %s480_s15 = sphi %s513_s15, %s636_s15   ;;  %s476_s14 = sphi %s511_s14, %s635_s14   ;;  %s472_s13 = sphi %s509_s13, %s634_s13   ;;  %s468_s12 = sphi %s507_s12, %s633_s12  }
   0x4   : > { %s532_s18 = sadd.s32 1, %s480_s15   ;;  %s91_s19 = sadd.s32 1, %s476_s14 }
   0x5   : > { %s88_s20 = ssub.s32 %s480_s15, %s532_s18  ;;  %p101_p0 = scmp.ne.s32.totalorder %s476_s14, %s472_s13 }
   0x6   : > { %p89_p1 = scmp.eq.s32.totalorder %s88_s20, 0  ;;  %p102_p2 = scmp.eq.s32.totalorder %s528_s16, 1 }
   0x7   : > { %p107_p3 = scmp.ne.s32.totalorder %s472_s13, %s468_s12  ;;  %p108_p4 = scmp.eq.s32.totalorder %s335_s17, 1 }
   0x8   : > { %s543_s21 = scalar_select %p89_p1, %s476_s14, %s91_s19  }
   0x9   : > { %p545_p5 = por %p102_p2, %p101_p0  ;;  %p549_p6 = por %p108_p4, %p107_p3 }
   0xa   : > { %p338_p7 = scmp.ge.s32.totalorder %s480_s15, 1  ;;  %p140_p8 = scmp.lt.s32.totalorder %s480_s15, 3 }
   0xc   : > { %p141_p9 = pnand %p338_p7, %p140_p8 }
   0xd   : > { %p164_p10 = scmp.lt.s32.totalorder (!%p141_p9), %s528_s16, 1  ;;  %s161_s10 = sand.u32 (!%p141_p9), 1, %s472_s13  }
   0xe   : > { %144 = sbr.rel (%p141_p9) target bundleno = 249 (0xf9), region = 32  ;;  %s339_s11 = sshll.u32 (!%p141_p9), %s161_s10, 4 }
   0xf   : > { %s163_s20 = scalar_lea.vmem (!%p141_p9), [#allocation2], %s339_s11  ;;  %s354_s25 = sshll.u32 (!%p141_p9), %s528_s16, 8 }
  0x10   : > { %s273_s24 = sshll.u32 (!%p141_p9), %s163_s20, 4  ;;  %s585_s30 = scalar_lea.hbm (!%p141_p9), %s630_s3, %s354_s25  ;;  %s580_s24 = int_to_ptr.vmem [resolvable:$true] %s273_s24 }
  0x11   : > { %s484_s5 = smov (!%p141_p9), [#allocation2]  }
  0x12   : > { %s424_s6 = sshll.u32 (!%p141_p9), %s484_s5, 4  ;;  %s425_s6 = int_to_ptr.vmem [resolvable:$false] %s424_s6 }
  0x13   : > { %v415_v0 = vld [vmem:[%s628_s1 + $0x18] sm:$0xff]   ;;  %v482_v1 = vmov 0.0   ;;  %v416_v2 = vld [vmem:[%s628_s1 + $0x10] sm:$0xff]   ;;  %vm483_vm0 = vmmov 0   ;;  %s165_s28 = scalar_select %p164_p10, %s528_s16, 1  ;;  %v417_v3 = vld [vmem:[%s628_s1 + $0x8] sm:$0xff]  }
  0x14   : > { %360 = vmatprep.subr.bf16.mxu0 %v482_v1  ;;  %368 = vmatprep.mubr.msk.bf16.mxu0 %vm483_vm0, %v482_v1  ;;  %v418_v4 = vld [vmem:[%s628_s1] sm:$0xff]   ;;  %vm211_vm1 = vcmask 523264   ;;  %vm256_vm2 = vcmask 261120   ;;  %v181_v10 = vld [vmem:[%s629_s2 + $0x8] sm:$0xff]  ;;  %s587_s16 = scalar_lea.sflag [#allocation3], %s161_s10  ;;  %p427_p0 = scmp.lt.s32.totalorder %s580_s24, %s425_s6 }
  0x15   : > { %361 = vmatpush3.bf16.msra.mxu0 %v415_v0  ;;  %s353_s4 = sshll.u32 %s165_s28, 3  ;;  %v180_v6 = vld [vmem:[%s629_s2] sm:$0xff] }
  0x16   : > { %362 = vmatprep.subr.bf16.mxu0 %v482_v1  ;;  %s168_s7 = scalar_lea.vmem %s627_s0, %s353_s4  ;;  %s420_s4 = scalar_lea.vmem %s580_s24, 256 }
  0x17   : > { %v419_v5 = vld [vmem:[%s168_s7] sm:$0xff]   ;;  %p421_p11 = scmp.ne.s32.totalorder %s580_s24, %s420_s4  ;;  %s426_s7 = scalar_lea.vmem %s425_s6, 512 }
  0x18   : > { %p428_p1 = scmp.lt.s32.totalorder %s426_s7, %s420_s4 }
  0x19   : > { %363 = vmatpush3.bf16.msra.mxu0 %v416_v2  ;;  %p422_p12 = pnand %p421_p11, %p545_p5 }
  0x1a   : > { %364 = vmatprep.subr.bf16.mxu0 %v482_v1  ;;  %p429_p2 = por %p428_p1, %p427_p0 }
  0x1b   : > { %p423_p13 = pneg %p422_p12 }
  0x1d   : > { %365 = vmatpush3.bf16.msra.mxu0 %v417_v3  ;;  %p430_p3 = pnand %p429_p2, %p423_p13 }
  0x1e   : > { %366 = vmatprep.subr.bf16.mxu0 %v482_v1 }
  0x21   : > { %367 = vmatpush3.bf16.msra.mxu0 %v418_v4 }
  0x24   : > { %369 = vmatmul.mubr.msk.bf16.vlgmr.msra.gmra.mxu0 %vm211_vm1, %v419_v5 }
  0xe4   : > { %v249_v7 = vpop.f32.mrf.mxu0 }
  0xe5   : > { %v250_v8 = vadd.f32 %v249_v7, %v180_v6 }
  0xe6   : > { %v370_v9 = vpop.f32.mrf.mxu0 }
  0xe7   : > { %257 = vst.msk [vmem:[%s163_s20] sm:$0xff] %vm256_vm2, %v250_v8 }
  0xe8   : > { %v252_v11 = vpop.f32.mrf.mxu0 }
  0xe9   : > { %v253_v12 = vadd.f32 %v252_v11, %v181_v10 }
  0xea   : > { %v371_v13 = vpop.f32.mrf.mxu0 }
  0xeb   : > { %258 = vst.msk [vmem:[%s163_s20 + $0x8] sm:$0xff] %vm256_vm2, %v253_v12 }
  0xec   : > { %433 = shalt.err (!%p430_p3)
}
  0xed   : > { %s434_s8 = scalar_lea.hbm %s585_s30, 256  ;;  %s438_s11 = scalar_lea.hbm %s630_s3, 512 }
  0xee   : > { %p435_p4 = scmp.ne.s32.totalorder %s585_s30, %s434_s8  ;;  %p439_p9 = scmp.lt.s32.totalorder %s585_s30, %s630_s3 }
  0xef   : > { %p440_p10 = scmp.lt.s32.totalorder %s438_s11, %s434_s8 }
  0xf0   : > { %p436_p7 = pnand %p435_p4, %p545_p5 }
  0xf1   : > { %p441_p11 = por %p440_p10, %p439_p9 }
  0xf2   : > { %p437_p8 = pneg %p436_p7 }
  0xf4   : > { %p442_p12 = pnand %p441_p11, %p437_p8 }
  0xf6   : > { %445 = shalt.err (!%p442_p12)
}
  0xf7   : > { %s485_s20 = smov 128   ;;  %s486_s25 = smov 8  }
  0xf8   : > { %372 = dma.vmem_to_hbm [thread:$0]  (%p545_p5), %s580_s24, 256, %s585_s30, %s587_s16, %s485_s20, %s485_s20, %s486_s25  }
  0xf9 PF: > { %p378_p13 = scmp.ge.s32.totalorder %s480_s15, 2  ;;  %s288_s26 = sand.u32 1, %s468_s12  }
  0xfa   : > { %s289_s27 = scalar_lea.sflag [#allocation3], %s288_s26 }
  0xfb   : > { %p375_p0 = pnand %p378_p13, %p549_p6 }
  0xfd   : > { %p376_p1 = pneg %p375_p0 }
  0xff   : > { %463 = dma.done.wait (%p376_p1), %s289_s27, 256  }
 0x100   : > { %465 = vsyncadd (%p376_p1), %s289_s27, 4294967040  ;;  %p13_p2 = scmp.ge.s32.totalorder %s532_s18, 4   ;;  %s633_s12 = smov %s472_s13 }
 0x101   : > { %s634_s13 = smov %s476_s14  ;;  %s635_s14 = smov %s543_s21 }
 0x102   : > { %s636_s15 = smov %s532_s18  ;;  %15 = sbr.rel (!%p13_p2) target bundleno = 3 (0x3), region = 67 }
 0x107   :  { %294 = vsyncpa [#allocation3], 1 }
 0x108   :  { %296 = vsyncpa [#allocation3 + $0x1], 1 }

</bundles_post_ra>
